<compile_context>
chip_gen: v5e
topology: v5e:2x2
jax: 0.10.0
libtpu: 0.0.40
codegen_flags: <defaults>
</compile_context>

<pallas_src>
import jax
import jax.numpy as jnp
from jax.experimental import pallas as pl
from jax.experimental.pallas import tpu as pltpu

LANE = 128


def _round_up(x, m):
    return ((x + m - 1) // m) * m


def _cdiv(a, b):
    return -(-a // b)


def _make_conv1d_kernel(K, TL):
    def kernel(xb_ref, xh_ref, w_ref, b_ref, o_ref):
        # xb_ref : (1, C_in, TL)    body tile of x
        # xh_ref : (1, C_in, HALO)  halo tile (the HALO lanes right after body)
        # w_ref  : (K, TC, C_in)    per-tap weights (w_t[k, co, ci] = w[co, ci, k])
        # b_ref  : (TC, 1)          bias column
        # o_ref  : (1, TC, TL)      output tile (TL multiple of 128 -> dense vst)
        xb = xb_ref[0]
        if K > 1:
            x_full = jnp.concatenate([xb, xh_ref[0]], axis=1)  # (C_in, TL+HALO)
        else:
            x_full = xb
        acc = jnp.dot(w_ref[0], x_full[:, :TL],
                      preferred_element_type=jnp.float32)
        for k in range(1, K):                      # static lane shifts per tap
            acc = acc + jnp.dot(w_ref[k], x_full[:, k:k + TL],
                                preferred_element_type=jnp.float32)
        o_ref[0] = (acc + b_ref[...]).astype(o_ref.dtype)

    return kernel


def _vmem_footprint_bytes(TL, TC, C_in, K, HALO, in_itemsize, x_buffers):
    """Approximate double-buffered VMEM footprint (with lane/sublane padding)."""
    sub = lambda v: _round_up(max(v, 1), 8)
    lane = lambda v: _round_up(max(v, 1), LANE)
    xb = x_buffers * sub(C_in) * TL * in_itemsize
    xh = 2 * sub(C_in) * HALO * in_itemsize
    w = 2 * K * sub(TC) * lane(C_in) * in_itemsize
    b = 2 * sub(TC) * lane(1) * 4
    o = 2 * sub(TC) * TL * 4
    return xb + xh + w + b + o


def conv1d_pallas(x, weight, bias, *, max_l_tile=2048, max_c_tile=128,
                  x_buffers=2, compute_dtype=jnp.float32):
    """aten.conv1d(x, weight, bias, stride=1, padding=0, dilation=1, groups=1)."""
    N, C_in, L = x.shape
    C_out, C_in_w, K = weight.shape
    assert C_in == C_in_w, "channel mismatch"
    L_out = L - K + 1
    assert L_out > 0, "kernel longer than input"

    x = x.astype(compute_dtype)
    weight = weight.astype(compute_dtype)
    bias = bias.astype(jnp.float32)
    in_itemsize = jnp.dtype(compute_dtype).itemsize

    # ---- tile sizing -------------------------------------------------------
    # Halo width: K-1 taps spill past the body tile; round up to whole lanes.
    HALO = _round_up(max(K - 1, 1), LANE)
    step = HALO if HALO > LANE else LANE          # TL must be a multiple of HALO

    # C_out tile (kept <=128 so the per-tile writeback stays cheap on v5e).
    TC = _round_up(C_out, 8) if C_out <= max_c_tile else max_c_tile
    num_c = _cdiv(C_out, TC)
    C_out_p = num_c * TC

    # Generation-aware VMEM budget (v7x: 64 MiB per TensorCore).
    try:
        vmem_cap = int(pltpu.get_tpu_info().vmem_capacity_bytes)
    except Exception:
        vmem_cap = 64 * 1024 * 1024               # conservative default
    budget = min(int(vmem_cap * 0.40), 48 * 1024 * 1024)

    # Adaptive L_out tile: biggest lane-dense tile under the VMEM budget.
    tl_cap = min(_round_up(max_l_tile, step), _round_up(L_out, step))
    TL = step
    t = step
    while t <= tl_cap:
        if _vmem_footprint_bytes(t, TC, C_in, K, HALO, in_itemsize,
                                 x_buffers) <= budget:
            TL = t
        t += step
    # TODO(synk): for very large C_in (e.g. 4096 on v7x) even TL=128 can blow
    # the budget; that needs a C_in contraction grid axis ("arbitrary") with an
    # f32 VMEM accumulator scratch.

    # Keep >=2 programs on a parallel axis for v7x megacore when possible.
    if N == 1 and num_c == 1:
        tl_half = _round_up((L_out + 1) // 2, step)
        if step <= tl_half < TL:
            TL = tl_half

    num_l = _cdiv(L_out, TL)
    L_out_p = num_l * TL
    ratio = TL // HALO                            # halo block-index stride per l

    # ---- operand layout ----------------------------------------------------
    # Pad x along L so every body tile plus the trailing halo block is in
    # bounds; the zero pad only feeds output positions that are sliced off.
    L_need = L_out_p + HALO
    x_pad = jnp.pad(x, ((0, 0), (0, 0), (0, L_need - L)))

    # Per-tap weight layout: w_t[k, co, ci] = weight[co, ci, k].
    w_t = jnp.transpose(weight, (2, 0, 1))
    w_t = jnp.pad(w_t, ((0, 0), (0, C_out_p - C_out), (0, 0)))
    b_col = jnp.pad(bias, (0, C_out_p - C_out)).reshape(C_out_p, 1)

    # ---- cost estimate (actual HBM traffic under this grid order) ----------
    bytes_accessed = (
        in_itemsize * N * num_l * C_in * (TL + HALO)            # x body + halo
        + in_itemsize * N * num_l * num_c * K * TC * C_in       # weights/step
        + 4 * N * num_l * num_c * TC                            # bias
        + 4 * N * C_out_p * L_out_p)                            # output write
    flops = 2 * N * C_out * C_in * K * L_out

    footprint = _vmem_footprint_bytes(TL, TC, C_in, K, HALO, in_itemsize,
                                      x_buffers)
    vmem_limit = int(min(vmem_cap * 0.60,
                         max(footprint + (16 << 20), 32 << 20)))

    x_body_kwargs = {}
    if x_buffers > 2:                             # opt-in deeper pipelining
        x_body_kwargs = dict(pipeline_mode=pl.Buffered(x_buffers))

    kernel = _make_conv1d_kernel(K, TL)

    out_p = pl.pallas_call(
        kernel,
        out_shape=jax.ShapeDtypeStruct((N, C_out_p, L_out_p), jnp.float32),
        grid_spec=pltpu.PrefetchScalarGridSpec(
            num_scalar_prefetch=0,
            grid=(N, num_l, num_c),               # C_out innermost: x stays put
            in_specs=[
                pl.BlockSpec((1, C_in, TL),
                             lambda n, l, c: (n, 0, l), **x_body_kwargs),
                pl.BlockSpec((1, C_in, HALO),
                             lambda n, l, c: (n, 0, (l + 1) * ratio)),
                pl.BlockSpec((K, TC, C_in), lambda n, l, c: (0, c, 0)),
                pl.BlockSpec((TC, 1), lambda n, l, c: (c, 0)),
            ],
            out_specs=pl.BlockSpec((1, TC, TL), lambda n, l, c: (n, c, l)),
        ),
        compiler_params=pltpu.CompilerParams(
            dimension_semantics=("parallel", "parallel", "parallel"),
            vmem_limit_bytes=vmem_limit,
        ),
        cost_estimate=pl.CostEstimate(
            flops=flops, transcendentals=0, bytes_accessed=int(bytes_accessed)),
    )(x_pad, x_pad, w_t, b_col)

    # Slice off C_out / L_out padding outside the kernel.
    return out_p[:, :C_out, :L_out]


def conv1d_ref(x, weight, bias):
    out = jax.lax.conv_general_dilated(
        x.astype(jnp.float32), weight.astype(jnp.float32),
        window_strides=(1,), padding="VALID",
        dimension_numbers=("NCH", "OIH", "NCH"))
    return out + bias[None, :, None]


if __name__ == "__main__":
    key = jax.random.PRNGKey(0)
    k1, k2, k3 = jax.random.split(key, 3)

    N, C_in, L = 2, 4, 16
    C_out, K = 8, 3

    x = jax.random.normal(k1, (N, C_in, L), dtype=jnp.float32)
    weight = jax.random.normal(k2, (C_out, C_in, K), dtype=jnp.float32) * 0.1
    bias = jax.random.normal(k3, (C_out,), dtype=jnp.float32)

    out = conv1d_pallas(x, weight, bias)
    out = jax.block_until_ready(out)

    ref = conv1d_ref(x, weight, bias)
    assert out.shape == ref.shape, (out.shape, ref.shape)
    assert jnp.allclose(out, ref, atol=1e-4, rtol=1e-4), "mismatch vs reference"

    print("KERNEL_OK")
</pallas_src>

<mosaic_0001>
module attributes {stable_mosaic.version = 11 : i64} {
  func.func @kernel(%arg0: i32, %arg1: i32, %arg2: i32, %arg3: memref<1x4x128xf32, #tpu.memory_space<vmem>>, %arg4: memref<1x4x128xf32, #tpu.memory_space<vmem>>, %arg5: memref<3x8x4xf32, #tpu.memory_space<vmem>>, %arg6: memref<8x1xf32, #tpu.memory_space<vmem>>, %arg7: memref<1x8x128xf32, #tpu.memory_space<vmem>>) attributes {dimension_semantics = [#tpu.dimension_semantics<parallel>, #tpu.dimension_semantics<parallel>, #tpu.dimension_semantics<parallel>], iteration_bounds = array<i64: 2, 1, 1>, scalar_prefetch = 0 : i64, scratch_operands = 0 : i64, tpu.core_type = #tpu.core_type<tc>, window_params = [{transform_indices = @transform_0, window_bounds = array<i64: 1, 4, 128>}, {transform_indices = @transform_1, window_bounds = array<i64: 1, 4, 128>}, {transform_indices = @transform_2, window_bounds = array<i64: 3, 8, 4>}, {transform_indices = @transform_3, window_bounds = array<i64: 8, 1>}, {transform_indices = @transform_4, window_bounds = array<i64: 1, 8, 128>}]} {
    %c0 = arith.constant 0 : index
    %c0_0 = arith.constant 0 : index
    %c0_1 = arith.constant 0 : index
    %0 = vector.load %arg3[%c0, %c0_0, %c0_1] : memref<1x4x128xf32, #tpu.memory_space<vmem>>, vector<1x4x128xf32>
    %1 = vector.shape_cast %0 : vector<1x4x128xf32> to vector<4x128xf32>
    %c0_2 = arith.constant 0 : index
    %c0_3 = arith.constant 0 : index
    %c0_4 = arith.constant 0 : index
    %2 = vector.load %arg4[%c0_2, %c0_3, %c0_4] : memref<1x4x128xf32, #tpu.memory_space<vmem>>, vector<1x4x128xf32>
    %3 = vector.shape_cast %2 : vector<1x4x128xf32> to vector<4x128xf32>
    %4 = tpu.concatenate %1, %3 in 1 : vector<4x128xf32>, vector<4x128xf32> -> vector<4x256xf32>
    %c0_5 = arith.constant 0 : index
    %c0_6 = arith.constant 0 : index
    %c0_7 = arith.constant 0 : index
    %5 = vector.load %arg5[%c0_5, %c0_6, %c0_7] : memref<3x8x4xf32, #tpu.memory_space<vmem>>, vector<1x8x4xf32>
    %6 = vector.shape_cast %5 : vector<1x8x4xf32> to vector<8x4xf32>
    %7 = vector.extract_strided_slice %4 {offsets = [0, 0], sizes = [4, 128], strides = [1, 1]} : vector<4x256xf32> to vector<4x128xf32>
    %cst = arith.constant dense<0.000000e+00> : vector<8x128xf32>
    %8 = tpu.matmul %6, %7, %cst {dimension_numbers = #tpu.dot_dimension_numbers<[1], [0], [0], [1], [0, 0, 1, 1], [], []>} : vector<8x4xf32>, vector<4x128xf32>, vector<8x128xf32> -> vector<8x128xf32>
    %c1 = arith.constant 1 : index
    %c0_8 = arith.constant 0 : index
    %c0_9 = arith.constant 0 : index
    %9 = vector.load %arg5[%c1, %c0_8, %c0_9] : memref<3x8x4xf32, #tpu.memory_space<vmem>>, vector<1x8x4xf32>
    %10 = vector.shape_cast %9 : vector<1x8x4xf32> to vector<8x4xf32>
    %11 = vector.extract_strided_slice %4 {offsets = [0, 1], sizes = [4, 128], strides = [1, 1]} : vector<4x256xf32> to vector<4x128xf32>
    %cst_10 = arith.constant dense<0.000000e+00> : vector<8x128xf32>
    %12 = tpu.matmul %10, %11, %cst_10 {dimension_numbers = #tpu.dot_dimension_numbers<[1], [0], [0], [1], [0, 0, 1, 1], [], []>} : vector<8x4xf32>, vector<4x128xf32>, vector<8x128xf32> -> vector<8x128xf32>
    %13 = arith.addf %8, %12 : vector<8x128xf32>
    %c2 = arith.constant 2 : index
    %c0_11 = arith.constant 0 : index
    %c0_12 = arith.constant 0 : index
    %14 = vector.load %arg5[%c2, %c0_11, %c0_12] : memref<3x8x4xf32, #tpu.memory_space<vmem>>, vector<1x8x4xf32>
    %15 = vector.shape_cast %14 : vector<1x8x4xf32> to vector<8x4xf32>
    %16 = vector.extract_strided_slice %4 {offsets = [0, 2], sizes = [4, 128], strides = [1, 1]} : vector<4x256xf32> to vector<4x128xf32>
    %cst_13 = arith.constant dense<0.000000e+00> : vector<8x128xf32>
    %17 = tpu.matmul %15, %16, %cst_13 {dimension_numbers = #tpu.dot_dimension_numbers<[1], [0], [0], [1], [0, 0, 1, 1], [], []>} : vector<8x4xf32>, vector<4x128xf32>, vector<8x128xf32> -> vector<8x128xf32>
    %18 = arith.addf %13, %17 : vector<8x128xf32>
    %c0_14 = arith.constant 0 : index
    %c0_15 = arith.constant 0 : index
    %19 = vector.load %arg6[%c0_14, %c0_15] : memref<8x1xf32, #tpu.memory_space<vmem>>, vector<8x1xf32>
    %20 = vector.broadcast %19 : vector<8x1xf32> to vector<8x128xf32>
    %21 = arith.addf %18, %20 : vector<8x128xf32>
    %c0_16 = arith.constant 0 : index
    %c0_17 = arith.constant 0 : index
    %c0_18 = arith.constant 0 : index
    %22 = vector.load %arg7[%c0_16, %c0_17, %c0_18] : memref<1x8x128xf32, #tpu.memory_space<vmem>>, vector<1x8x128xf32>
    %23 = vector.shape_cast %22 : vector<1x8x128xf32> to vector<8x128xf32>
    %24 = vector.shape_cast %21 : vector<8x128xf32> to vector<1x8x128xf32>
    tpu.vector_store %arg7[%c0_16, %c0_17, %c0_18], %24 {strides = array<i32>} : memref<1x8x128xf32, #tpu.memory_space<vmem>>, vector<1x8x128xf32>,
    return
  }
  func.func @transform_0(%arg0: i32, %arg1: i32, %arg2: i32) -> (i32, i32, i32) {
    %c0_i32 = arith.constant 0 : i32
    %c0_i32_0 = arith.constant 0 : i32
    return %arg0, %c0_i32, %arg1 : i32, i32, i32
  }
  func.func @transform_1(%arg0: i32, %arg1: i32, %arg2: i32) -> (i32, i32, i32) {
    %c1_i32 = arith.constant 1 : i32
    %0 = arith.addi %arg1, %c1_i32 : i32
    %c1_i32_0 = arith.constant 1 : i32
    %1 = arith.muli %0, %c1_i32_0 : i32
    %c0_i32 = arith.constant 0 : i32
    %c0_i32_1 = arith.constant 0 : i32
    return %arg0, %c0_i32, %1 : i32, i32, i32
  }
  func.func @transform_2(%arg0: i32, %arg1: i32, %arg2: i32) -> (i32, i32, i32) {
    %c0_i32 = arith.constant 0 : i32
    %c0_i32_0 = arith.constant 0 : i32
    %c0_i32_1 = arith.constant 0 : i32
    return %c0_i32, %arg2, %c0_i32_0 : i32, i32, i32
  }
  func.func @transform_3(%arg0: i32, %arg1: i32, %arg2: i32) -> (i32, i32) {
    %c0_i32 = arith.constant 0 : i32
    %c0_i32_0 = arith.constant 0 : i32
    return %arg2, %c0_i32 : i32, i32
  }
  func.func @transform_4(%arg0: i32, %arg1: i32, %arg2: i32) -> (i32, i32, i32) {
    %c0_i32 = arith.constant 0 : i32
    return %arg0, %arg2, %arg1 : i32, i32, i32
  }
}

</mosaic_0001>

<bundles_post_ra>
// kernel: tpu_custom_call.1
= control target key start
LH: loop header
LB: loop body
LE: loop exit
PB: predicated region body
PF: predicated region fallthrough
CT: control target
= control target key end

     0   :  { %9 = vsyncpa [#allocation3], 0  ;;  %s867_s0 = inlined_call_operand.vmem [shape: f32[2,4,256], index: 0, kind: input, shape index: {}]   ;;  %s868_s1 = inlined_call_operand.vmem [shape: f32[2,4,256], index: 1, kind: input, shape index: {}]   ;;  %s869_s2 = inlined_call_operand.vmem [shape: f32[3,8,4], index: 2, kind: input, shape index: {}]   ;;  %s870_s3 = inlined_call_operand.vmem [shape: f32[8,1], index: 3, kind: input, shape index: {}]   ;;  %s871_s4 = inlined_call_operand.hbm [shape: f32[2,8,128], index: 4, kind: output, shape index: {}]  }
   0x1   :  { %11 = vsyncpa [#allocation3 + $0x1], 0  ;;  %s749_s15 = smov 0   ;;  %s751_s16 = smov 0  }
   0x2   :  { %s753_s17 = smov 0   ;;  %s755_s18 = smov 0  }
   0x3   :  { %s757_s19 = smov 0   ;;  %s759_s20 = smov 0  }
   0x4 LB: > { %s553_s21 = sadd.s32 4294967295, %s719_s20   ;;  %s554_s22 = sadd.s32 4294967294, %s719_s20   ;;  %s719_s20 = sphi %s759_s20, %s17_s20   ;;  %s715_s19 = sphi %s757_s19, %s878_s19   ;;  %s711_s18 = sphi %s755_s18, %s877_s18   ;;  %s707_s17 = sphi %s753_s17, %s876_s17   ;;  %s703_s16 = sphi %s751_s16, %s875_s16   ;;  %s699_s15 = sphi %s749_s15, %s874_s15  }
   0x5   : > { %s36_s23 = sadd.s32 1, %s715_s19  ;;  %s157_s24 = sadd.s32 1, %s707_s17 }
   0x6   : > { %p38_p0 = scmp.ge.s32.totalorder %s36_s23, 2  ;;  %p167_p1 = scmp.ne.s32.totalorder %s707_s17, %s703_s16 }
   0x7   : > { %p168_p2 = scmp.eq.s32.totalorder %s553_s21, 1  ;;  %p173_p3 = scmp.ne.s32.totalorder %s703_s16, %s699_s15 }
   0x8   : > { %s880_s23 = smov (%p38_p0, %s36_s23), 0  ;;  %p174_p5 = scmp.eq.s32.totalorder %s554_s22, 1 }
   0x9   : > { %p789_p4 = por %p168_p2, %p167_p1  ;;  %s150_s26 = ssub.s32 %s715_s19, %s880_s23 }
   0xa   : > { %p559_p6 = scmp.ge.s32.totalorder %s719_s20, 1  ;;  %p155_p7 = scmp.eq.s32.totalorder %s150_s26, 0 }
   0xb   : > { %p796_p8 = por %p174_p5, %p173_p3  ;;  %p230_p9 = scmp.lt.s32.totalorder %s719_s20, 3 }
   0xc   : > { %s802_s28 = scalar_select %p155_p7, %s707_s17, %s157_s24  }
   0xd   : > { %p231_p10 = pnand %p559_p6, %p230_p9 }
   0xe   : > { %p276_p11 = scmp.lt.s32.totalorder (!%p231_p10), %s711_s18, 1  ;;  %s721_s9 = smov (!%p231_p10), 127  }
   0xf   : > { %234 = sbr.rel (%p231_p10) target bundleno = 289 (0x121), region = 36  ;;  %s722_s10 = smov (!%p231_p10), 126  }
  0x10   : > { %s273_s6 = sand.u32 (!%p231_p10), 1, %s703_s16  }
  0x11   : > { %s410_s21 = scalar_lea.sflag (!%p231_p10), [#allocation3], %s273_s6 }
  0x14   : > { %s277_s29 = scalar_select %p276_p11, %s711_s18, 1  ;;  %vm319_vm0 = vcmask 1043456   ;;  %vm315_vm1 = vcmask 31744   ;;  %v304_v2 = vld [vmem:[%s869_s2] sm:$0xff]  ;;  %v723_v4 = vmov 0   ;;  %vm313_vm2 = vcmask 1039360  }
  0x15   : > { %v401_v3 = vld [vmem:[%s870_s3] sm:$0xff]  ;;  %639 = vset.pattern.permute.xlu2 %v723_v4  ;;  %640 = vset.pattern.permute.xlu0 %v723_v4  ;;  %vm373_vm3 = vcmask 1031168   ;;  %v570_v9 = vld [vmem:[%s869_s2 + $0x10] sm:$0xff]  ;;  %v565_v10 = vld [vmem:[%s869_s2 + $0x8] sm:$0xff] }
  0x16   : > { %s577_s30 = sshll.u32 %s277_s29, 3  ;;  %404 = vperm.xlu2 %639, %v401_v3   ;;  %s661_s29 = scalar_lea.hbm %s871_s4, 16 }
  0x17   : > { %s283_s7 = scalar_lea.vmem %s867_s0, %s577_s30  ;;  %s579_s8 = sadd.s32 4, %s577_s30 }
  0x18   : > { %v302_v0 = vld [vmem:[%s283_s7] sm:$0xf]  ;;  %s292_s13 = scalar_lea.vmem %s868_s1, %s579_s8  ;;  %s560_s7 = sshll.u32 %s273_s6, 3 }
  0x19   : > { %309 = vrot.lane.b32.xlu1 %v302_v0, %s721_s9  ;;  %369 = vrot.lane.b32.xlu0 %v302_v0, %s722_s10  ;;  %v303_v1 = vld [vmem:[%s292_s13] sm:$0xf]  ;;  %s574_s8 = sshll.u32 %s711_s18, 3  ;;  %s275_s12 = scalar_lea.vmem [#allocation2], %s560_s7 }
  0x1a   : > { %568 = vmatpush.msk.msra.mxu1 %vm319_vm0, %v302_v0  ;;  %s422_s11 = scalar_lea.hbm %s871_s4, %s574_s8  ;;  %s424_s13 = sshll.u32 %s275_s12, 4  ;;  %s425_s13 = int_to_ptr.vmem [resolvable:$true] %s424_s13 }
  0x1b   : > { %569 = vmatmul.msk.f32.vlgmr.msra.gmra.mxu1 %vm315_vm1, %v304_v2  ;;  %s426_s14 = sshll.u32 %s422_s11, 4  ;;  %s427_s14 = int_to_ptr.hbm [resolvable:$true] %s426_s14 }
  0x1c   : > { %s655_s22 = sshra.s32 %s427_s14, 4  ;;  %s656_s22 = int_to_ptr.hbm [resolvable:$true] %s655_s22 }
  0x1d   : > { %s657_s18 = scalar_lea.hbm %s656_s22, 8  ;;  %p662_p1 = scmp.lt.s32.totalorder %s656_s22, %s871_s4 }
  0x1e   : > { %p658_p12 = scmp.ne.s32.totalorder %s656_s22, %s657_s18  ;;  %p663_p2 = scmp.lt.s32.totalorder %s661_s29, %s657_s18 }
  0x20   : > { %p659_p13 = pnand %p658_p12, %p789_p4  ;;  %p664_p3 = por %p663_p2, %p662_p1 }
  0x21   : > { %311 = vrot.lane.b32.xlu1 %v303_v1, %s721_s9  ;;  %371 = vrot.lane.b32.xlu0 %v303_v1, %s722_s10 }
  0x22   : > { %p660_p0 = pneg %p659_p13 }
  0x24   : > { %p665_p5 = pnand %p664_p3, %p660_p0 }
  0x70   : > { %v405_v17 = vpop.permute.xlu2 %404 }
  0x8b   : > { %v310_v5 = vpop.permute.xlu1 %309  ;;  %v370_v6 = vpop.permute.xlu0 %369 }
  0x93   : > { %v312_v7 = vpop.permute.xlu1 %311  ;;  %v372_v8 = vpop.permute.xlu0 %371 }
  0x94   : > { %v314_v11 = vsel %vm313_vm2, %v310_v5, %v312_v7  ;;  %v374_v12 = vsel %vm373_vm3, %v370_v6, %v372_v8 }
  0x95   : > { %566 = vmatpush.msk.msra.mxu0 %vm319_vm0, %v314_v11  ;;  %571 = vmatpush.msk.msra.mxu2 %vm319_vm0, %v374_v12 }
  0x96   : > { %572 = vmatmul.msk.f32.vlgmr.msra.gmra.mxu2 %vm315_vm1, %v570_v9  ;;  %567 = vmatmul.msk.f32.vlgmr.msra.gmra.mxu0 %vm315_vm1, %v565_v10 }
  0x98   : > { %v364_v14 = vpop.f32.mrf.mxu1 }
 0x113   : > { %v339_v13 = vpop.f32.mrf.mxu0 }
 0x114   : > { %v365_v15 = vadd.f32 %v364_v14, %v339_v13 }
 0x119   : > { %v397_v16 = vpop.f32.mrf.mxu2 }
 0x11a   : > { %v400_v18 = vadd.f32 %v397_v16, %v365_v15 }
 0x11c   : > { %v407_v19 = vadd.f32 %v405_v17, %v400_v18 }
 0x11e   : > { %408 = vst [vmem:[%s275_s12] sm:$0xff] %v407_v19 }
 0x11f   : > { %668 = shalt.err (!%p665_p5)
}
 0x120   : > { %581 = dma.vmem_to_hbm [thread:$0]  (%p789_p4), %s425_s13, 128, %s427_s14, %s410_s21  }
 0x121 PF: > { %p587_p6 = scmp.ge.s32.totalorder %s719_s20, 2  ;;  %s438_s6 = sand.u32 1, %s699_s15  }
 0x122   : > { %s439_s7 = scalar_lea.sflag [#allocation3], %s438_s6 }
 0x123   : > { %p584_p7 = pnand %p587_p6, %p796_p8 }
 0x125   : > { %p585_p9 = pneg %p584_p7 }
 0x127   : > { %694 = dma.done.wait (%p585_p9), %s439_s7, 128  }
 0x128   : > { %696 = vsyncadd (%p585_p9), %s439_s7, 4294967168  ;;  %s17_s20 = sadd.s32 1, %s719_s20   ;;  %s874_s15 = smov %s703_s16 }
 0x129   : > { %p14_p10 = scmp.ge.s32.totalorder %s17_s20, 4   ;;  %s875_s16 = smov %s707_s17 }
 0x12a   : > { %s876_s17 = smov %s802_s28  ;;  %s877_s18 = smov %s715_s19 }
 0x12b   : > { %s878_s19 = smov %s880_s23  ;;  %16 = sbr.rel (!%p14_p10) target bundleno = 4 (0x4), region = 82 }
 0x130   :  { %445 = vsyncpa [#allocation3], 1 }
 0x131   :  { %447 = vsyncpa [#allocation3 + $0x1], 1 }

</bundles_post_ra>
